<compile_context>
chip_gen: v7x
topology: tpu7x:2x2x1
jax: 0.10.0
libtpu: 0.0.40
codegen_flags: <defaults>
</compile_context>

<pallas_src>
import functools

import jax
import jax.numpy as jnp
import numpy as np
from jax import lax
from jax.experimental import pallas as pl
from jax.experimental.pallas import tpu as pltpu


def _round_up(x, m):
    return ((x + m - 1) // m) * m


def _cdiv(a, b):
    return (a + b - 1) // b


def _quantize_kernel(x_ref, w_ref, inv_ref, q_ref, sse_ref, *,
                     n_rows, n_embed, block_rows, dim, fold,
                     mask_codebook, mask_rows, scores_in_bf16):
    """One grid step over `block_rows` input rows.

    Rows are presented lane-folded: `fold` consecutive dim-wide rows share one
    (fold*dim)-lane row, so the input load and quantized writeback are
    lane-dense even when dim < 128.

    x_ref  : (block_rows//fold, fold*dim)  input rows (folded layout)
    w_ref  : (k_pad, dim)                  raw codebook rows (padded rows zero)
    inv_ref: (1, k_pad)                    1/||w_k|| per codeword (0 for pads)
    q_ref  : (block_rows//fold, fold*dim)  quantized rows (folded layout)
    sse_ref: (1, 1, 1)                     per-block partial sum of squared err
    """
    w = w_ref[...].astype(jnp.float32)               # (kp, dim), resident
    inv = inv_ref[...]                               # (1, kp)
    kp = w.shape[0]
    rg = block_rows // fold

    # Hoisted out of the per-group loop (JAX does not CSE broadcasts/casts).
    col = lax.broadcasted_iota(jnp.int32, (rg, kp), 1)
    w_mm = w.astype(jnp.bfloat16) if scores_in_bf16 else w
    if mask_rows:
        r_iota = lax.broadcasted_iota(jnp.int32, (rg, 1), 0)
        row_base = pl.program_id(0) * block_rows + fold * r_iota     # (rg, 1)

    # x (rg, dim) contracted with w (kp, dim) along dim -> (rg, kp), no
    # explicit transpose value materialized.
    dn_score = (((1,), (1,)), ((), ()))

    sse = jnp.float32(0.0)
    for j in range(fold):                     # static unroll (fold <= 4)
        xj = x_ref[:, j * dim:(j + 1) * dim].astype(jnp.float32)     # (rg, dim)

        # argmin(||x - e_k||^2) == argmax(x . e_k) for unit-norm e_k; the
        # normalization is a cheap per-column scale AFTER the MXU matmul so
        # only one codebook copy is streamed / resident.
        x_mm = xj.astype(jnp.bfloat16) if scores_in_bf16 else xj
        score = lax.dot_general(x_mm, w_mm, dn_score,
                                preferred_element_type=jnp.float32)  # (rg, kp)
        score = score * inv
        if mask_codebook:   # statically skipped when k_pad == n_embed
            score = jnp.where(col < n_embed, score, -jnp.inf)

        mx = jnp.max(score, axis=1, keepdims=True)
        ind = jnp.min(jnp.where(score == mx, col, kp),
                      axis=1, keepdims=True)                          # (rg, 1)

        # Gather raw codebook rows via a one-hot matmul (exact, MXU).
        # TODO(synk): for very large n_embed switch to a take-style gather on
        # the resident codebook to halve MXU work if vmatmul ever binds.
        onehot = (col == ind).astype(jnp.float32)                     # (rg, kp)
        qj = jnp.dot(onehot, w, preferred_element_type=jnp.float32)   # (rg, dim)
        q_ref[:, j * dim:(j + 1) * dim] = qj.astype(q_ref.dtype)

        # Per-block partial SSE; the row-validity mask only exists when the
        # wrapper actually added padding rows (statically compiled out else).
        d = qj - xj
        if mask_rows:
            valid = ((row_base + j) < n_rows).astype(jnp.float32)     # (rg, 1)
            d = d * valid
        sse = sse + jnp.sum(d * d)

    sse_ref[...] = sse.reshape(1, 1, 1)


def quantize_forward(x, weight, *, block_rows=1024, scores_in_bf16=False):
    """Forward pass of Quantize.

    x      : (..., dim) floating point
    weight : (n_embed, dim) float32 codebook (nn.Embedding.weight)
    returns (quantized: same shape/dtype as x, diff: scalar f32)
    """
    orig_shape = x.shape
    n_embed, dim = weight.shape
    flat = x.reshape(-1, dim)
    n_rows = flat.shape[0]
    itemsize = jnp.dtype(x.dtype).itemsize

    # --- Codebook prep (hoisted: done once, not per grid step) ---------------
    w32 = weight.astype(jnp.float32)
    # eps guards a zero-norm codeword from turning into NaN scores.
    inv_norm = lax.rsqrt(jnp.sum(w32 * w32, axis=1) + 1e-12)          # (n_embed,)

    # Pad codeword count to a lane / MXU-column multiple.  Padded codewords are
    # zero rows with inv_norm 0 and are masked to -inf before the argmax.
    k_pad = _round_up(n_embed, 128)
    if k_pad == n_embed:
        w_pad = w32
        inv_pad = inv_norm.reshape(1, n_embed)
    else:
        w_pad = jnp.zeros((k_pad, dim), jnp.float32).at[:n_embed].set(w32)
        inv_pad = jnp.zeros((1, k_pad), jnp.float32).at[0, :n_embed].set(inv_norm)

    # --- Row blocking ---------------------------------------------------------
    # Fold `fold` consecutive rows into one 128-lane row so loads / stores /
    # writeback DMAs are lane-dense even for small dim (dim=32 -> fold=4).
    fold = 128 // dim if (dim < 128 and 128 % dim == 0) else 1
    sub = 8 if itemsize >= 4 else (16 if itemsize == 2 else 32)
    align = sub * fold

    # Big blocks amortize the ~0.35us per-grid-step overhead; cap so the
    # (block, k_pad) f32 score/onehot intermediates plus double-buffered x/q
    # blocks stay well inside every generation's VMEM (v7x: 64 MiB physical).
    vmem_budget = 24 << 20
    per_row = 4 * dim * itemsize + 2 * k_pad * 4
    max_rows = max(align, (vmem_budget // per_row) // align * align)
    blk = min(block_rows, max_rows, _round_up(n_rows, align))
    blk = _round_up(blk, align)
    n_blocks = _cdiv(n_rows, blk)
    # v7x megacore: keep >= 2 parallel grid steps when rows are plentiful so
    # both TensorCores get work (no effect on single-TC v5e/v6e).
    if n_blocks == 1 and n_rows >= 256:
        blk = _round_up(_cdiv(n_rows, 2), align)
        n_blocks = _cdiv(n_rows, blk)
    rows_pad = n_blocks * blk

    # Skip the full pad copy (and the in-kernel row mask) when not needed.
    if rows_pad == n_rows:
        flat_use = flat
        mask_rows = False
    else:
        flat_use = jnp.zeros((rows_pad, dim), flat.dtype).at[:n_rows].set(flat)
        mask_rows = True
    # Lane-fold: free row-major metadata reshape in XLA (no data movement).
    x_fold = flat_use.reshape(rows_pad // fold, fold * dim)
    rg = blk // fold

    kernel = functools.partial(
        _quantize_kernel,
        n_rows=n_rows, n_embed=n_embed, block_rows=blk, dim=dim, fold=fold,
        mask_codebook=(k_pad != n_embed), mask_rows=mask_rows,
        scores_in_bf16=scores_in_bf16)

    # Explicit VMEM limit (the scoped default is 16/32 MiB depending on gen).
    vmem_bytes = (4 * rg * fold * dim * itemsize            # x + q, double-buffered
                  + k_pad * dim * 4 + k_pad * 4             # codebook + inv (1 buf)
                  + 6 * rg * k_pad * 4                      # score/onehot/iota temps
                  + (2 << 20))                              # headroom
    vmem_limit = int(min(max(vmem_bytes, 16 << 20), 64 << 20))

    q_fold, sse = pl.pallas_call(
        kernel,
        out_shape=(
            jax.ShapeDtypeStruct((rows_pad // fold, fold * dim), x.dtype),
            jax.ShapeDtypeStruct((n_blocks, 1, 1), jnp.float32),    # SSE partials
        ),
        grid_spec=pltpu.PrefetchScalarGridSpec(
            num_scalar_prefetch=0,
            grid=(n_blocks,),
            in_specs=[
                pl.BlockSpec((rg, fold * dim), lambda i: (i, 0)),       # x rows
                pl.BlockSpec((k_pad, dim), lambda i: (0, 0),            # codebook
                             pipeline_mode=pl.Buffered(1)),
                pl.BlockSpec((1, k_pad), lambda i: (0, 0),              # 1/||w_k||
                             pipeline_mode=pl.Buffered(1)),
            ],
            out_specs=[
                pl.BlockSpec((rg, fold * dim), lambda i: (i, 0)),       # q rows
                pl.BlockSpec((1, 1, 1), lambda i: (i, 0, 0)),           # SSE partial
            ],
        ),
        # No cross-iteration state -> the grid axis is parallel (2x on v7x
        # megacore; neutral on single-TC v5e/v6e).
        compiler_params=pltpu.CompilerParams(
            dimension_semantics=("parallel",),
            vmem_limit_bytes=vmem_limit),
    )(x_fold, w_pad, inv_pad)

    if rows_pad == n_rows:
        quantized = q_fold.reshape(orig_shape)
    else:
        quantized = q_fold.reshape(rows_pad, dim)[:n_rows].reshape(orig_shape)
    diff = jnp.sum(sse) / jnp.float32(n_rows * dim)
    return quantized, diff


def _reference(x, weight):
    """Pure-JAX reference mirroring the PyTorch forward."""
    dim = weight.shape[1]
    embed = weight.T
    embed = embed / jnp.linalg.norm(embed, axis=0)
    flat = x.reshape(-1, dim)
    dist = (flat ** 2).sum(1, keepdims=True) - 2.0 * flat @ embed \
        + (embed ** 2).sum(0, keepdims=True)
    ind = jnp.argmax(-dist, axis=1)
    q = weight[ind].reshape(x.shape)
    diff = jnp.mean((q - x) ** 2)
    quantize_1 = x + (q - x)
    return (q + quantize_1) / 2.0, diff


def _check(x, weight):
    quantized, diff = quantize_forward(x, weight)
    quantized = jax.block_until_ready(quantized)
    diff = jax.block_until_ready(diff)
    q_ref, d_ref = _reference(x, weight)
    np.testing.assert_allclose(np.asarray(quantized), np.asarray(q_ref),
                               rtol=1e-5, atol=1e-5)
    np.testing.assert_allclose(float(diff), float(d_ref), rtol=1e-5, atol=1e-6)


if __name__ == "__main__":
    dim = 32
    n_embed = 64

    key = jax.random.PRNGKey(0)
    kx1, kx2, kw = jax.random.split(key, 3)
    weight = jax.random.normal(kw, (n_embed, dim), dtype=jnp.float32)

    # Small case consistent with the module: input (B, T, dim) = (2, 8, 32).
    x_small = jax.random.normal(kx1, (2, 8, dim), dtype=jnp.float32)
    _check(x_small, weight)

    # Larger case: 400 rows -> 2 parallel grid blocks (megacore path) with row
    # padding/masking in the last block; exercises fold + multi-block paths.
    x_big = jax.random.normal(kx2, (4, 100, dim), dtype=jnp.float32)
    _check(x_big, weight)

    print("KERNEL_OK")
</pallas_src>

<mosaic_0001>
module attributes {stable_mosaic.version = 11 : i64} {
  func.func @_quantize_kernel(%arg0: i32, %arg1: memref<8x128xf32, #tpu.memory_space<vmem>>, %arg2: memref<128x32xf32, #tpu.memory_space<vmem>>, %arg3: memref<1x128xf32, #tpu.memory_space<vmem>>, %arg4: memref<8x128xf32, #tpu.memory_space<vmem>>, %arg5: memref<1x1x1xf32, #tpu.memory_space<vmem>>) attributes {dimension_semantics = [#tpu.dimension_semantics<parallel>], iteration_bounds = array<i64: 1>, scalar_prefetch = 0 : i64, scratch_operands = 0 : i64, tpu.core_type = #tpu.core_type<tc>, window_params = [{transform_indices = @transform_0, window_bounds = array<i64: 8, 128>}, {pipeline_mode = #tpu.pipeline_mode<synchronous>, transform_indices = @transform_1, window_bounds = array<i64: 128, 32>}, {pipeline_mode = #tpu.pipeline_mode<synchronous>, transform_indices = @transform_2, window_bounds = array<i64: 1, 128>}, {transform_indices = @transform_3, window_bounds = array<i64: 8, 128>}, {transform_indices = @transform_4, window_bounds = array<i64: 1, 1, 1>}]} {
    %c0 = arith.constant 0 : index
    %c0_0 = arith.constant 0 : index
    %0 = vector.load %arg2[%c0, %c0_0] : memref<128x32xf32, #tpu.memory_space<vmem>>, vector<128x32xf32>
    %c0_1 = arith.constant 0 : index
    %c0_2 = arith.constant 0 : index
    %1 = vector.load %arg3[%c0_1, %c0_2] : memref<1x128xf32, #tpu.memory_space<vmem>>, vector<1x128xf32>
    %2 = tpu.iota {dimensions = array<i32: 1>} : vector<8x128xi32>
    %3 = tpu.iota {dimensions = array<i32: 0>} : vector<8x1xi32>
    %c32_i32 = arith.constant 32 : i32
    %4 = arith.muli %arg0, %c32_i32 : i32
    %c4_i32 = arith.constant 4 : i32
    %5 = vector.broadcast %c4_i32 : i32 to vector<8x1xi32>
    %6 = arith.muli %5, %3 : vector<8x1xi32>
    %7 = vector.broadcast %4 : i32 to vector<8x1xi32>
    %8 = arith.addi %7, %6 : vector<8x1xi32>
    %c0_3 = arith.constant 0 : index
    %c0_4 = arith.constant 0 : index
    %9 = vector.load %arg1[%c0_3, %c0_4] : memref<8x128xf32, #tpu.memory_space<vmem>>, vector<8x32xf32>
    %cst = arith.constant dense<0.000000e+00> : vector<8x128xf32>
    %10 = tpu.matmul %9, %0, %cst {dimension_numbers = #tpu.dot_dimension_numbers<[1], [1], [0], [0], [0, 0, 1, 0], [], []>} : vector<8x32xf32>, vector<128x32xf32>, vector<8x128xf32> -> vector<8x128xf32>
    %11 = vector.broadcast %1 : vector<1x128xf32> to vector<8x128xf32>
    %12 = arith.mulf %10, %11 : vector<8x128xf32>
    %c64_i32 = arith.constant 64 : i32
    %13 = vector.broadcast %c64_i32 : i32 to vector<8x128xi32>
    %14 = arith.cmpi slt, %2, %13 : vector<8x128xi32>
    %cst_5 = arith.constant 0xFF800000 : f32
    %15 = vector.broadcast %cst_5 : f32 to vector<8x128xf32>
    %16 = arith.select %14, %12, %15 : vector<8x128xi1>, vector<8x128xf32>
    %cst_6 = arith.constant dense<0xFF800000> : vector<8xf32>
    %17 = vector.multi_reduction <maximumf>, %16, %cst_6 [1] : vector<8x128xf32> to vector<8xf32>
    %18 = vector.shape_cast %17 : vector<8xf32> to vector<8x1xf32>
    %19 = vector.broadcast %18 : vector<8x1xf32> to vector<8x128xf32>
    %20 = arith.cmpf oeq, %16, %19 : vector<8x128xf32>
    %c128_i32 = arith.constant 128 : i32
    %21 = vector.broadcast %c128_i32 : i32 to vector<8x128xi32>
    %22 = arith.select %20, %2, %21 : vector<8x128xi1>, vector<8x128xi32>
    %cst_7 = arith.constant dense<2147483647> : vector<8xi32>
    %23 = vector.multi_reduction <minsi>, %22, %cst_7 [1] : vector<8x128xi32> to vector<8xi32>
    %24 = vector.shape_cast %23 : vector<8xi32> to vector<8x1xi32>
    %25 = vector.broadcast %24 : vector<8x1xi32> to vector<8x128xi32>
    %26 = arith.cmpi eq, %2, %25 : vector<8x128xi32>
    %27 = arith.extui %26 : vector<8x128xi1> to vector<8x128xi32>
    %28 = arith.sitofp %27 : vector<8x128xi32> to vector<8x128xf32>
    %cst_8 = arith.constant dense<0.000000e+00> : vector<8x32xf32>
    %29 = tpu.matmul %28, %0, %cst_8 {dimension_numbers = #tpu.dot_dimension_numbers<[1], [0], [0], [1], [0, 0, 1, 1], [], []>} : vector<8x128xf32>, vector<128x32xf32>, vector<8x32xf32> -> vector<8x32xf32>
    %c0_9 = arith.constant 0 : index
    %c0_10 = arith.constant 0 : index
    %30 = vector.load %arg4[%c0_9, %c0_10] : memref<8x128xf32, #tpu.memory_space<vmem>>, vector<8x32xf32>
    tpu.vector_store %arg4[%c0_9, %c0_10], %29 {strides = array<i32>} : memref<8x128xf32, #tpu.memory_space<vmem>>, vector<8x32xf32>,
    %31 = arith.subf %29, %9 : vector<8x32xf32>
    %c0_i32 = arith.constant 0 : i32
    %32 = vector.broadcast %c0_i32 : i32 to vector<8x1xi32>
    %33 = arith.addi %8, %32 : vector<8x1xi32>
    %c16_i32 = arith.constant 16 : i32
    %34 = vector.broadcast %c16_i32 : i32 to vector<8x1xi32>
    %35 = arith.cmpi slt, %33, %34 : vector<8x1xi32>
    %36 = arith.extui %35 : vector<8x1xi1> to vector<8x1xi32>
    %37 = arith.sitofp %36 : vector<8x1xi32> to vector<8x1xf32>
    %38 = vector.broadcast %37 : vector<8x1xf32> to vector<8x32xf32>
    %39 = arith.mulf %31, %38 : vector<8x32xf32>
    %40 = arith.mulf %39, %39 : vector<8x32xf32>
    %41 = vector.shape_cast %40 : vector<8x32xf32> to vector<1x8x32xf32>
    %cst_11 = arith.constant dense<0.000000e+00> : vector<1xf32>
    %42 = vector.multi_reduction <add>, %41, %cst_11 [1, 2] : vector<1x8x32xf32> to vector<1xf32>
    %43 = vector.shape_cast %42 : vector<1xf32> to vector<1x1x1xf32>
    %44 = vector.extract %43[0, 0, 0] : f32 from vector<1x1x1xf32>
    %cst_12 = arith.constant 0.000000e+00 : f32
    %45 = arith.addf %cst_12, %44 : f32
    %c0_13 = arith.constant 0 : index
    %c32 = arith.constant 32 : index
    %46 = vector.load %arg1[%c0_13, %c32] : memref<8x128xf32, #tpu.memory_space<vmem>>, vector<8x32xf32>
    %cst_14 = arith.constant dense<0.000000e+00> : vector<8x128xf32>
    %47 = tpu.matmul %46, %0, %cst_14 {dimension_numbers = #tpu.dot_dimension_numbers<[1], [1], [0], [0], [0, 0, 1, 0], [], []>} : vector<8x32xf32>, vector<128x32xf32>, vector<8x128xf32> -> vector<8x128xf32>
    %48 = vector.broadcast %1 : vector<1x128xf32> to vector<8x128xf32>
    %49 = arith.mulf %47, %48 : vector<8x128xf32>
    %c64_i32_15 = arith.constant 64 : i32
    %50 = vector.broadcast %c64_i32_15 : i32 to vector<8x128xi32>
    %51 = arith.cmpi slt, %2, %50 : vector<8x128xi32>
    %cst_16 = arith.constant 0xFF800000 : f32
    %52 = vector.broadcast %cst_16 : f32 to vector<8x128xf32>
    %53 = arith.select %51, %49, %52 : vector<8x128xi1>, vector<8x128xf32>
    %cst_17 = arith.constant dense<0xFF800000> : vector<8xf32>
    %54 = vector.multi_reduction <maximumf>, %53, %cst_17 [1] : vector<8x128xf32> to vector<8xf32>
    %55 = vector.shape_cast %54 : vector<8xf32> to vector<8x1xf32>
    %56 = vector.broadcast %55 : vector<8x1xf32> to vector<8x128xf32>
    %57 = arith.cmpf oeq, %53, %56 : vector<8x128xf32>
    %c128_i32_18 = arith.constant 128 : i32
    %58 = vector.broadcast %c128_i32_18 : i32 to vector<8x128xi32>
    %59 = arith.select %57, %2, %58 : vector<8x128xi1>, vector<8x128xi32>
    %cst_19 = arith.constant dense<2147483647> : vector<8xi32>
    %60 = vector.multi_reduction <minsi>, %59, %cst_19 [1] : vector<8x128xi32> to vector<8xi32>
    %61 = vector.shape_cast %60 : vector<8xi32> to vector<8x1xi32>
    %62 = vector.broadcast %61 : vector<8x1xi32> to vector<8x128xi32>
    %63 = arith.cmpi eq, %2, %62 : vector<8x128xi32>
    %64 = arith.extui %63 : vector<8x128xi1> to vector<8x128xi32>
    %65 = arith.sitofp %64 : vector<8x128xi32> to vector<8x128xf32>
    %cst_20 = arith.constant dense<0.000000e+00> : vector<8x32xf32>
    %66 = tpu.matmul %65, %0, %cst_20 {dimension_numbers = #tpu.dot_dimension_numbers<[1], [0], [0], [1], [0, 0, 1, 1], [], []>} : vector<8x128xf32>, vector<128x32xf32>, vector<8x32xf32> -> vector<8x32xf32>
    %c0_21 = arith.constant 0 : index
    %c32_22 = arith.constant 32 : index
    %67 = vector.load %arg4[%c0_21, %c32_22] : memref<8x128xf32, #tpu.memory_space<vmem>>, vector<8x32xf32>
    tpu.vector_store %arg4[%c0_21, %c32_22], %66 {strides = array<i32>} : memref<8x128xf32, #tpu.memory_space<vmem>>, vector<8x32xf32>,
    %68 = arith.subf %66, %46 : vector<8x32xf32>
    %c1_i32 = arith.constant 1 : i32
    %69 = vector.broadcast %c1_i32 : i32 to vector<8x1xi32>
    %70 = arith.addi %8, %69 : vector<8x1xi32>
    %c16_i32_23 = arith.constant 16 : i32
    %71 = vector.broadcast %c16_i32_23 : i32 to vector<8x1xi32>
    %72 = arith.cmpi slt, %70, %71 : vector<8x1xi32>
    %73 = arith.extui %72 : vector<8x1xi1> to vector<8x1xi32>
    %74 = arith.sitofp %73 : vector<8x1xi32> to vector<8x1xf32>
    %75 = vector.broadcast %74 : vector<8x1xf32> to vector<8x32xf32>
    %76 = arith.mulf %68, %75 : vector<8x32xf32>
    %77 = arith.mulf %76, %76 : vector<8x32xf32>
    %78 = vector.shape_cast %77 : vector<8x32xf32> to vector<1x8x32xf32>
    %cst_24 = arith.constant dense<0.000000e+00> : vector<1xf32>
    %79 = vector.multi_reduction <add>, %78, %cst_24 [1, 2] : vector<1x8x32xf32> to vector<1xf32>
    %80 = vector.shape_cast %79 : vector<1xf32> to vector<1x1x1xf32>
    %81 = vector.extract %80[0, 0, 0] : f32 from vector<1x1x1xf32>
    %82 = arith.addf %45, %81 : f32
    %c0_25 = arith.constant 0 : index
    %c64 = arith.constant 64 : index
    %83 = vector.load %arg1[%c0_25, %c64] : memref<8x128xf32, #tpu.memory_space<vmem>>, vector<8x32xf32>
    %cst_26 = arith.constant dense<0.000000e+00> : vector<8x128xf32>
    %84 = tpu.matmul %83, %0, %cst_26 {dimension_numbers = #tpu.dot_dimension_numbers<[1], [1], [0], [0], [0, 0, 1, 0], [], []>} : vector<8x32xf32>, vector<128x32xf32>, vector<8x128xf32> -> vector<8x128xf32>
    %85 = vector.broadcast %1 : vector<1x128xf32> to vector<8x128xf32>
    %86 = arith.mulf %84, %85 : vector<8x128xf32>
    %c64_i32_27 = arith.constant 64 : i32
    %87 = vector.broadcast %c64_i32_27 : i32 to vector<8x128xi32>
    %88 = arith.cmpi slt, %2, %87 : vector<8x128xi32>
    %cst_28 = arith.constant 0xFF800000 : f32
    %89 = vector.broadcast %cst_28 : f32 to vector<8x128xf32>
    %90 = arith.select %88, %86, %89 : vector<8x128xi1>, vector<8x128xf32>
    %cst_29 = arith.constant dense<0xFF800000> : vector<8xf32>
    %91 = vector.multi_reduction <maximumf>, %90, %cst_29 [1] : vector<8x128xf32> to vector<8xf32>
    %92 = vector.shape_cast %91 : vector<8xf32> to vector<8x1xf32>
    %93 = vector.broadcast %92 : vector<8x1xf32> to vector<8x128xf32>
    %94 = arith.cmpf oeq, %90, %93 : vector<8x128xf32>
    %c128_i32_30 = arith.constant 128 : i32
    %95 = vector.broadcast %c128_i32_30 : i32 to vector<8x128xi32>
    %96 = arith.select %94, %2, %95 : vector<8x128xi1>, vector<8x128xi32>
    %cst_31 = arith.constant dense<2147483647> : vector<8xi32>
    %97 = vector.multi_reduction <minsi>, %96, %cst_31 [1] : vector<8x128xi32> to vector<8xi32>
    %98 = vector.shape_cast %97 : vector<8xi32> to vector<8x1xi32>
    %99 = vector.broadcast %98 : vector<8x1xi32> to vector<8x128xi32>
    %100 = arith.cmpi eq, %2, %99 : vector<8x128xi32>
    %101 = arith.extui %100 : vector<8x128xi1> to vector<8x128xi32>
    %102 = arith.sitofp %101 : vector<8x128xi32> to vector<8x128xf32>
    %cst_32 = arith.constant dense<0.000000e+00> : vector<8x32xf32>
    %103 = tpu.matmul %102, %0, %cst_32 {dimension_numbers = #tpu.dot_dimension_numbers<[1], [0], [0], [1], [0, 0, 1, 1], [], []>} : vector<8x128xf32>, vector<128x32xf32>, vector<8x32xf32> -> vector<8x32xf32>
    %c0_33 = arith.constant 0 : index
    %c64_34 = arith.constant 64 : index
    %104 = vector.load %arg4[%c0_33, %c64_34] : memref<8x128xf32, #tpu.memory_space<vmem>>, vector<8x32xf32>
    tpu.vector_store %arg4[%c0_33, %c64_34], %103 {strides = array<i32>} : memref<8x128xf32, #tpu.memory_space<vmem>>, vector<8x32xf32>,
    %105 = arith.subf %103, %83 : vector<8x32xf32>
    %c2_i32 = arith.constant 2 : i32
    %106 = vector.broadcast %c2_i32 : i32 to vector<8x1xi32>
    %107 = arith.addi %8, %106 : vector<8x1xi32>
    %c16_i32_35 = arith.constant 16 : i32
    %108 = vector.broadcast %c16_i32_35 : i32 to vector<8x1xi32>
    %109 = arith.cmpi slt, %107, %108 : vector<8x1xi32>
    %110 = arith.extui %109 : vector<8x1xi1> to vector<8x1xi32>
    %111 = arith.sitofp %110 : vector<8x1xi32> to vector<8x1xf32>
    %112 = vector.broadcast %111 : vector<8x1xf32> to vector<8x32xf32>
    %113 = arith.mulf %105, %112 : vector<8x32xf32>
    %114 = arith.mulf %113, %113 : vector<8x32xf32>
    %115 = vector.shape_cast %114 : vector<8x32xf32> to vector<1x8x32xf32>
    %cst_36 = arith.constant dense<0.000000e+00> : vector<1xf32>
    %116 = vector.multi_reduction <add>, %115, %cst_36 [1, 2] : vector<1x8x32xf32> to vector<1xf32>
    %117 = vector.shape_cast %116 : vector<1xf32> to vector<1x1x1xf32>
    %118 = vector.extract %117[0, 0, 0] : f32 from vector<1x1x1xf32>
    %119 = arith.addf %82, %118 : f32
    %c0_37 = arith.constant 0 : index
    %c96 = arith.constant 96 : index
    %120 = vector.load %arg1[%c0_37, %c96] : memref<8x128xf32, #tpu.memory_space<vmem>>, vector<8x32xf32>
    %cst_38 = arith.constant dense<0.000000e+00> : vector<8x128xf32>
    %121 = tpu.matmul %120, %0, %cst_38 {dimension_numbers = #tpu.dot_dimension_numbers<[1], [1], [0], [0], [0, 0, 1, 0], [], []>} : vector<8x32xf32>, vector<128x32xf32>, vector<8x128xf32> -> vector<8x128xf32>
    %122 = vector.broadcast %1 : vector<1x128xf32> to vector<8x128xf32>
    %123 = arith.mulf %121, %122 : vector<8x128xf32>
    %c64_i32_39 = arith.constant 64 : i32
    %124 = vector.broadcast %c64_i32_39 : i32 to vector<8x128xi32>
    %125 = arith.cmpi slt, %2, %124 : vector<8x128xi32>
    %cst_40 = arith.constant 0xFF800000 : f32
    %126 = vector.broadcast %cst_40 : f32 to vector<8x128xf32>
    %127 = arith.select %125, %123, %126 : vector<8x128xi1>, vector<8x128xf32>
    %cst_41 = arith.constant dense<0xFF800000> : vector<8xf32>
    %128 = vector.multi_reduction <maximumf>, %127, %cst_41 [1] : vector<8x128xf32> to vector<8xf32>
    %129 = vector.shape_cast %128 : vector<8xf32> to vector<8x1xf32>
    %130 = vector.broadcast %129 : vector<8x1xf32> to vector<8x128xf32>
    %131 = arith.cmpf oeq, %127, %130 : vector<8x128xf32>
    %c128_i32_42 = arith.constant 128 : i32
    %132 = vector.broadcast %c128_i32_42 : i32 to vector<8x128xi32>
    %133 = arith.select %131, %2, %132 : vector<8x128xi1>, vector<8x128xi32>
    %cst_43 = arith.constant dense<2147483647> : vector<8xi32>
    %134 = vector.multi_reduction <minsi>, %133, %cst_43 [1] : vector<8x128xi32> to vector<8xi32>
    %135 = vector.shape_cast %134 : vector<8xi32> to vector<8x1xi32>
    %136 = vector.broadcast %135 : vector<8x1xi32> to vector<8x128xi32>
    %137 = arith.cmpi eq, %2, %136 : vector<8x128xi32>
    %138 = arith.extui %137 : vector<8x128xi1> to vector<8x128xi32>
    %139 = arith.sitofp %138 : vector<8x128xi32> to vector<8x128xf32>
    %cst_44 = arith.constant dense<0.000000e+00> : vector<8x32xf32>
    %140 = tpu.matmul %139, %0, %cst_44 {dimension_numbers = #tpu.dot_dimension_numbers<[1], [0], [0], [1], [0, 0, 1, 1], [], []>} : vector<8x128xf32>, vector<128x32xf32>, vector<8x32xf32> -> vector<8x32xf32>
    %c0_45 = arith.constant 0 : index
    %c96_46 = arith.constant 96 : index
    %141 = vector.load %arg4[%c0_45, %c96_46] : memref<8x128xf32, #tpu.memory_space<vmem>>, vector<8x32xf32>
    tpu.vector_store %arg4[%c0_45, %c96_46], %140 {strides = array<i32>} : memref<8x128xf32, #tpu.memory_space<vmem>>, vector<8x32xf32>,
    %142 = arith.subf %140, %120 : vector<8x32xf32>
    %c3_i32 = arith.constant 3 : i32
    %143 = vector.broadcast %c3_i32 : i32 to vector<8x1xi32>
    %144 = arith.addi %8, %143 : vector<8x1xi32>
    %c16_i32_47 = arith.constant 16 : i32
    %145 = vector.broadcast %c16_i32_47 : i32 to vector<8x1xi32>
    %146 = arith.cmpi slt, %144, %145 : vector<8x1xi32>
    %147 = arith.extui %146 : vector<8x1xi1> to vector<8x1xi32>
    %148 = arith.sitofp %147 : vector<8x1xi32> to vector<8x1xf32>
    %149 = vector.broadcast %148 : vector<8x1xf32> to vector<8x32xf32>
    %150 = arith.mulf %142, %149 : vector<8x32xf32>
    %151 = arith.mulf %150, %150 : vector<8x32xf32>
    %152 = vector.shape_cast %151 : vector<8x32xf32> to vector<1x8x32xf32>
    %cst_48 = arith.constant dense<0.000000e+00> : vector<1xf32>
    %153 = vector.multi_reduction <add>, %152, %cst_48 [1, 2] : vector<1x8x32xf32> to vector<1xf32>
    %154 = vector.shape_cast %153 : vector<1xf32> to vector<1x1x1xf32>
    %155 = vector.extract %154[0, 0, 0] : f32 from vector<1x1x1xf32>
    %156 = arith.addf %119, %155 : f32
    %157 = vector.broadcast %156 : f32 to vector<1x1x1xf32>
    %c0_49 = arith.constant 0 : index
    %c0_50 = arith.constant 0 : index
    %c0_51 = arith.constant 0 : index
    %158 = vector.load %arg5[%c0_49, %c0_50, %c0_51] : memref<1x1x1xf32, #tpu.memory_space<vmem>>, vector<1x1x1xf32>
    tpu.vector_store %arg5[%c0_49, %c0_50, %c0_51], %157 {strides = array<i32>} : memref<1x1x1xf32, #tpu.memory_space<vmem>>, vector<1x1x1xf32>,
    return
  }
  func.func @transform_0(%arg0: i32) -> (i32, i32) {
    %c0_i32 = arith.constant 0 : i32
    %c0_i32_0 = arith.constant 0 : i32
    return %arg0, %c0_i32 : i32, i32
  }
  func.func @transform_1(%arg0: i32) -> (i32, i32) {
    %c0_i32 = arith.constant 0 : i32
    %c0_i32_0 = arith.constant 0 : i32
    %c0_i32_1 = arith.constant 0 : i32
    return %c0_i32, %c0_i32_0 : i32, i32
  }
  func.func @transform_2(%arg0: i32) -> (i32, i32) {
    %c0_i32 = arith.constant 0 : i32
    %c0_i32_0 = arith.constant 0 : i32
    %c0_i32_1 = arith.constant 0 : i32
    return %c0_i32, %c0_i32_0 : i32, i32
  }
  func.func @transform_3(%arg0: i32) -> (i32, i32) {
    %c0_i32 = arith.constant 0 : i32
    %c0_i32_0 = arith.constant 0 : i32
    return %arg0, %c0_i32 : i32, i32
  }
  func.func @transform_4(%arg0: i32) -> (i32, i32, i32) {
    %c0_i32 = arith.constant 0 : i32
    %c0_i32_0 = arith.constant 0 : i32
    %c0_i32_1 = arith.constant 0 : i32
    return %arg0, %c0_i32, %c0_i32_0 : i32, i32, i32
  }
}

</mosaic_0001>

<bundles_post_ra>
// kernel: tpu_custom_call.1
= control target key start
LH: loop header
LB: loop body
LE: loop exit
PB: predicated region body
PF: predicated region fallthrough
CT: control target
= control target key end

     0   :  { %10 = vsyncpa [#allocation3], 0  ;;  %vm44_vm0 = vcmask 261120   ;;  %v1683_v2 = vmov 0.0|0.0   ;;  %vm1684_vm2 = vmmov 0   ;;  %v1685_v7 = vmov 0.0   ;;  %s2112_s0 = inlined_call_operand.vmem [shape: f32[8,128], index: 0, kind: input, shape index: {}]   ;;  %s2113_s1 = inlined_call_operand.vmem [shape: f32[128,32], index: 1, kind: input, shape index: {}]   ;;  %s2114_s2 = inlined_call_operand.vmem [shape: f32[1,128], index: 2, kind: input, shape index: {}]   ;;  %s2115_s3 = inlined_call_operand.hbm [shape: f32[8,128], index: 3, kind: output, shape index: {0}]   ;;  %s2116_s4 = inlined_call_operand.hbm [shape: f32[1,1,1], index: 4, kind: output, shape index: {1}]  }
   0x1   :  { %v18_v0 = vld [vmem:[%s2113_s1] sm:$0xff]  ;;  %v19_v1 = vld [vmem:[%s2113_s1 + $0x8] sm:$0xff]  ;;  %1394 = vmatprep.subr.bf16.mxu0 %v1683_v2  ;;  %vm1728_vm1 = vmpackc.low %vm44_vm0, %vm44_vm0  ;;  %1426 = vmatprep.subr.bf16.mxu1 %v1683_v2 }
   0x2   :  { %v1724_v3 = vpack.c.bf16 %v19_v1, %v18_v0  ;;  %v20_v5 = vld [vmem:[%s2113_s1 + $0x10] sm:$0xff]  ;;  %v21_v6 = vld [vmem:[%s2113_s1 + $0x18] sm:$0xff]  ;;  %1146 = vmatprep.mubr.msk.f32.mxu0 %vm1684_vm2, %v1685_v7  ;;  %1181 = vmatprep.mubr.msk.f32.mxu1 %vm1684_vm2, %v1685_v7  ;;  %v22_v9 = vld [vmem:[%s2113_s1 + $0x20] sm:$0xff] }
   0x3   :  { %v1749_v8 = vpack.c.bf16 %v21_v6, %v20_v5  ;;  %v23_v10 = vld [vmem:[%s2113_s1 + $0x28] sm:$0xff] }
   0x4   :  { %1397 = vmatpush3.bf16.xpose.msk.msra.mxu0 %vm1728_vm1, %v1724_v3  ;;  %1428 = vmatpush3.bf16.msra.mxu1 %v1724_v3 }
   0x5   :  { %1398 = vmatprep.subr.bf16.mxu0 %v1683_v2  ;;  %1429 = vmatprep.subr.bf16.mxu1 %v1683_v2 }
   0x6   :  { %11 = vsyncpa [#allocation5], 0  ;;  %v1759_v11 = vpack.c.bf16 %v23_v10, %v22_v9  ;;  %v24_v12 = vld [vmem:[%s2113_s1 + $0x30] sm:$0xff]  ;;  %v25_v13 = vld [vmem:[%s2113_s1 + $0x38] sm:$0xff]  ;;  %v35_v28 = vlaneseq  ;;  %v1687_v48 = vmov 1.0   ;;  %s1688_s23 = smov 64  }
   0x7   :  { %v1773_v14 = vpack.c.bf16 %v25_v13, %v24_v12  ;;  %v26_v15 = vld [vmem:[%s2113_s1 + $0x40] sm:$0xff]  ;;  %v27_v16 = vld [vmem:[%s2113_s1 + $0x48] sm:$0xff]  ;;  %v28_v18 = vld [vmem:[%s2113_s1 + $0x50] sm:$0xff]  ;;  %s1689_s24 = smov 32   ;;  %s1690_s25 = smov [#allocation2]  }
   0x8   :  { %1431 = vmatpush3.bf16.msra.mxu1 %v1749_v8  ;;  %v1783_v17 = vpack.c.bf16 %v27_v16, %v26_v15  ;;  %v29_v19 = vld [vmem:[%s2113_s1 + $0x58] sm:$0xff]  ;;  %v30_v21 = vld [vmem:[%s2113_s1 + $0x60] sm:$0xff]  ;;  %v31_v22 = vld [vmem:[%s2113_s1 + $0x68] sm:$0xff]  ;;  %v1867_v29 = vand.u32 127, %v35_v28  ;;  %s875_s26 = sshll.u32 %s1690_s25, 4  ;;  %s876_s26 = int_to_ptr.vmem [resolvable:$true] %s875_s26 }
   0x9   :  { %1432 = vmatprep.subr.bf16.mxu1 %v1683_v2  ;;  %v1797_v20 = vpack.c.bf16 %v29_v19, %v28_v18  ;;  %v1807_v23 = vpack.c.bf16 %v31_v22, %v30_v21  ;;  %v32_v24 = vld [vmem:[%s2113_s1 + $0x70] sm:$0xff]  ;;  %v33_v25 = vld [vmem:[%s2113_s1 + $0x78] sm:$0xff]  ;;  %v1844_v27 = vld [vmem:[%s2112_s0] sm:$0xff]  ;;  %s1635_s27 = scalar_lea.vmem %s876_s26, 128  ;;  %p1640_p1 = scmp.lt.s32.totalorder %s876_s26, %s876_s26 }
   0xa   :  { %v1821_v26 = vpack.c.bf16 %v33_v25, %v32_v24  ;;  %v1872_v30 = vld [vmem:[%s2114_s2] ss:$0 sm:$0xff]  ;;  %vm173_vm3 = vcmp.lt.s32.totalorder %v1867_v29, 64  ;;  %s1686_s2 = smov 96   ;;  %p1636_p0 = scmp.ne.s32.totalorder %s876_s26, %s1635_s27 }
   0xb   :  { %p1641_p2 = scmp.lt.s32.totalorder %s1635_s27, %s1635_s27 }
   0xc   :  { %1401 = vmatpush3.bf16.xpose.msk.msra.mxu0 %vm1728_vm1, %v1749_v8  ;;  %1434 = vmatpush3.bf16.msra.mxu1 %v1759_v11 }
   0xd   :  { %1402 = vmatprep.subr.bf16.mxu0 %v1683_v2  ;;  %1435 = vmatprep.subr.bf16.mxu1 %v1683_v2  ;;  %p1642_p3 = por %p1641_p2, %p1640_p1 }
   0xf   :  { %p1643_p4 = pnand %p1642_p3, %p1636_p0 }
  0x10   :  { %1437 = vmatpush3.bf16.msra.mxu1 %v1773_v14 }
  0x11   :  { %1438 = vmatprep.subr.bf16.mxu1 %v1683_v2 }
  0x14   :  { %1405 = vmatpush3.bf16.xpose.msk.msra.mxu0 %vm1728_vm1, %v1759_v11  ;;  %1440 = vmatpush3.bf16.msra.mxu1 %v1783_v17 }
  0x15   :  { %1406 = vmatprep.subr.bf16.mxu0 %v1683_v2  ;;  %1441 = vmatprep.subr.bf16.mxu1 %v1683_v2 }
  0x18   :  { %1443 = vmatpush3.bf16.msra.mxu1 %v1797_v20 }
  0x19   :  { %1444 = vmatprep.subr.bf16.mxu1 %v1683_v2 }
  0x1c   :  { %1409 = vmatpush3.bf16.xpose.msk.msra.mxu0 %vm1728_vm1, %v1773_v14  ;;  %1446 = vmatpush3.bf16.msra.mxu1 %v1807_v23 }
  0x1d   :  { %1410 = vmatprep.subr.bf16.mxu0 %v1683_v2  ;;  %1447 = vmatprep.subr.bf16.mxu1 %v1683_v2 }
  0x20   :  { %1449 = vmatpush3.bf16.msra.mxu1 %v1821_v26 }
  0x21   :  { %1450 = vmatprep.subr.bf16.mxu1 %v1683_v2 }
  0x24   :  { %1413 = vmatpush3.bf16.xpose.msk.msra.mxu0 %vm1728_vm1, %v1783_v17 }
  0x25   :  { %1414 = vmatprep.subr.bf16.mxu0 %v1683_v2 }
  0x2c   :  { %1417 = vmatpush3.bf16.xpose.msk.msra.mxu0 %vm1728_vm1, %v1797_v20 }
  0x2d   :  { %1418 = vmatprep.subr.bf16.mxu0 %v1683_v2 }
  0x34   :  { %1421 = vmatpush3.bf16.xpose.msk.msra.mxu0 %vm1728_vm1, %v1807_v23 }
  0x35   :  { %1422 = vmatprep.subr.bf16.mxu0 %v1683_v2 }
  0x3c   :  { %1425 = vmatpush3.bf16.xpose.msk.msra.mxu0 %vm1728_vm1, %v1821_v26 }
  0x3d   :  { %1482 = vmatprep.subr.bf16.mxu0 %v1683_v2 }
  0x43   :  { %1147 = vmatmul.mubr.msk.f32.vlgmr.msra.gmra.mrb[0].mxu0 %vm44_vm0, %v1844_v27 }
  0x44   :  { %1484 = vmatpush3.bf16.msra.mxu0 %v1724_v3  ;;  %1251 = vmatprep.mubr.msk.f32.mxu0 %vm1684_vm2, %v1685_v7 }
  0x45   :  { %1485 = vmatprep.subr.bf16.mxu0 %v1683_v2 }
  0x48   :  { %1487 = vmatpush3.bf16.msra.mxu0 %v1749_v8 }
  0x49   :  { %1488 = vmatprep.subr.bf16.mxu0 %v1683_v2 }
  0x4c   :  { %1490 = vmatpush3.bf16.msra.mxu0 %v1759_v11 }
  0x4d   :  { %1491 = vmatprep.subr.bf16.mxu0 %v1683_v2 }
  0x50   :  { %1493 = vmatpush3.bf16.msra.mxu0 %v1773_v14 }
  0x51   :  { %1494 = vmatprep.subr.bf16.mxu0 %v1683_v2 }
  0x54   :  { %1496 = vmatpush3.bf16.msra.mxu0 %v1783_v17 }
  0x55   :  { %1497 = vmatprep.subr.bf16.mxu0 %v1683_v2 }
  0x58   :  { %1499 = vmatpush3.bf16.msra.mxu0 %v1797_v20 }
  0x59   :  { %1500 = vmatprep.subr.bf16.mxu0 %v1683_v2 }
  0x5c   :  { %1502 = vmatpush3.bf16.msra.mxu0 %v1807_v23 }
  0x5d   :  { %1503 = vmatprep.subr.bf16.mxu0 %v1683_v2 }
  0x60   :  { %1505 = vmatpush3.bf16.msra.mxu0 %v1821_v26 }
  0x61   :  { %1506 = vmatprep.subr.bf16.mxu0 %v1683_v2 }
 0x116   :  { %v162_v31 = vpop.f32.mrb[0].mxu0 }
 0x117   :  { %v172_v32 = vmul.f32 %v1872_v30, %v162_v31  ;;  %v1148_v33 = vpop.f32.mrb[1].mxu0 }
 0x119   :  { %v174_v34 = vsel %vm173_vm3, %v172_v32, -inf }
 0x11a   :  { %175 = vmax.xlane.f32.xlu0 %v174_v34 }
 0x1a7   :  { %v176_v35 = vpop.xlane.xlu0 %175 }
 0x1a8   :  { %vm177_vm4 = vcmp.eq.f32.partialorder %v174_v34, %v176_v35 }
 0x1a9   :  { %v178_v36 = vsel %vm177_vm4, %v1867_v29, 128 }
 0x1aa   :  { %v180_v37 = vshra.s32 %v178_v36, 16  ;;  %v179_v39 = vand.u32 65535, %v178_v36 }
 0x1ac   :  { %v182_v38 = vcvt.s32.f32 %v180_v37  ;;  %v181_v41 = vcvt.s32.f32 %v179_v39 }
 0x1ae   :  { %183 = vmin.xlane.f32.xlu0 %v182_v38 }
 0x23b   :  { %v184_v40 = vpop.xlane.xlu0 %183 }
 0x23c   :  { %vm185_vm5 = vcmp.eq.f32.partialorder %v182_v38, %v184_v40  ;;  %v190_v43 = vcvt.f32.s32 %v184_v40 }
 0x23d   :  { %v186_v42 = vsel %vm185_vm5, %v181_v41, inf  ;;  %vm457_vm5 = vcmask 523520  }
 0x23e   :  { %187 = vmin.xlane.f32.xlu1 %v186_v42  ;;  %v191_v45 = vshll.u32 %v190_v43, 16 }
 0x24f   :  { %286 = vrot.lane.b32.xlu1 %v1844_v27, %s1686_s2 }
 0x2cb   :  { %v188_v44 = vpop.xlane.xlu1 %187 }
 0x2cc   :  { %v189_v46 = vcvt.f32.s32 %v188_v44 }
 0x2ce   :  { %v192_v47 = vadd.s32 %v191_v45, %v189_v46 }
 0x2cf   :  { %v1917_v49 = vpop.permute.xlu1 %286 }
 0x2d0   :  { %vm193_vm6 = vcmp.eq.s32.totalorder %v1867_v29, %v192_v47 }
 0x2d1   :  { %1182 = vmatmul.mubr.msk.f32.vlgmr.msra.gmra.mrb[0].mxu1 %vm193_vm6, %v1687_v48  ;;  %vm651_vm6 = vcmask 785920  }
 0x2d2   :  { %1453 = vmatpush3.bf16.xpose.msk.msra.mxu1 %vm1728_vm1, %v1724_v3  ;;  %1216 = vmatprep.mubr.msk.f32.mxu1 %vm1684_vm2, %v1685_v7 }
 0x2d3   :  { %1454 = vmatprep.subr.bf16.mxu1 %v1683_v2 }
 0x2da   :  { %1457 = vmatpush3.bf16.xpose.msk.msra.mxu1 %vm1728_vm1, %v1749_v8 }
 0x2db   :  { %1458 = vmatprep.subr.bf16.mxu1 %v1683_v2 }
 0x2e2   :  { %1461 = vmatpush3.bf16.xpose.msk.msra.mxu1 %vm1728_vm1, %v1759_v11 }
 0x2e3   :  { %1462 = vmatprep.subr.bf16.mxu1 %v1683_v2 }
 0x2ea   :  { %1465 = vmatpush3.bf16.xpose.msk.msra.mxu1 %vm1728_vm1, %v1773_v14 }
 0x2eb   :  { %1466 = vmatprep.subr.bf16.mxu1 %v1683_v2 }
 0x2f2   :  { %1469 = vmatpush3.bf16.xpose.msk.msra.mxu1 %vm1728_vm1, %v1783_v17 }
 0x2f3   :  { %1470 = vmatprep.subr.bf16.mxu1 %v1683_v2 }
 0x2fa   :  { %1473 = vmatpush3.bf16.xpose.msk.msra.mxu1 %vm1728_vm1, %v1797_v20 }
 0x2fb   :  { %1474 = vmatprep.subr.bf16.mxu1 %v1683_v2 }
 0x302   :  { %1477 = vmatpush3.bf16.xpose.msk.msra.mxu1 %vm1728_vm1, %v1807_v23 }
 0x303   :  { %1478 = vmatprep.subr.bf16.mxu1 %v1683_v2 }
 0x30a   :  { %1481 = vmatpush3.bf16.xpose.msk.msra.mxu1 %vm1728_vm1, %v1821_v26 }
 0x30b   :  { %1538 = vmatprep.subr.bf16.mxu1 %v1683_v2 }
 0x311   :  { %1217 = vmatmul.mubr.msk.f32.vlgmr.msra.gmra.mrb[2].mxu1 %vm44_vm0, %v1917_v49 }
 0x312   :  { %1540 = vmatpush3.bf16.msra.mxu1 %v1724_v3  ;;  %1321 = vmatprep.mubr.msk.f32.mxu1 %vm1684_vm2, %v1685_v7 }
 0x313   :  { %1541 = vmatprep.subr.bf16.mxu1 %v1683_v2 }
 0x316   :  { %1543 = vmatpush3.bf16.msra.mxu1 %v1749_v8 }
 0x317   :  { %1544 = vmatprep.subr.bf16.mxu1 %v1683_v2 }
 0x31a   :  { %1546 = vmatpush3.bf16.msra.mxu1 %v1759_v11 }
 0x31b   :  { %1547 = vmatprep.subr.bf16.mxu1 %v1683_v2 }
 0x31e   :  { %1549 = vmatpush3.bf16.msra.mxu1 %v1773_v14 }
 0x31f   :  { %1550 = vmatprep.subr.bf16.mxu1 %v1683_v2 }
 0x322   :  { %1552 = vmatpush3.bf16.msra.mxu1 %v1783_v17 }
 0x323   :  { %1553 = vmatprep.subr.bf16.mxu1 %v1683_v2 }
 0x326   :  { %1555 = vmatpush3.bf16.msra.mxu1 %v1797_v20 }
 0x327   :  { %1556 = vmatprep.subr.bf16.mxu1 %v1683_v2 }
 0x32a   :  { %1558 = vmatpush3.bf16.msra.mxu1 %v1807_v23 }
 0x32b   :  { %1559 = vmatprep.subr.bf16.mxu1 %v1683_v2 }
 0x32e   :  { %1561 = vmatpush3.bf16.msra.mxu1 %v1821_v26 }
 0x32f   :  { %1562 = vmatprep.subr.bf16.mxu1 %v1683_v2 }
 0x3a4   :  { %v1939_v50 = vpop.f32.mrb[0].mxu1 }
 0x3a5   :  { %266 = vst.msk [vmem:[#allocation2] sm:$0xff] %vm44_vm0, %v1939_v50  ;;  %v1183_v51 = vpop.f32.mrb[1].mxu1  ;;  %v267_v40 = vsub.f32 %v1939_v50, %v1844_v27 }
 0x3e4   :  { %v356_v52 = vpop.f32.mrb[2].mxu1 }
 0x3e5   :  { %v360_v53 = vmul.f32 %v1872_v30, %v356_v52  ;;  %v1218_v54 = vpop.f32.mrb[3].mxu1 }
 0x3e7   :  { %v361_v55 = vsel %vm173_vm3, %v360_v53, -inf }
 0x3e8   :  { %362 = vmax.xlane.f32.xlu0 %v361_v55 }
 0x475   :  { %v363_v56 = vpop.xlane.xlu0 %362 }
 0x476   :  { %vm364_vm7 = vcmp.eq.f32.partialorder %v361_v55, %v363_v56 }
 0x477   :  { %v365_v57 = vsel %vm364_vm7, %v1867_v29, 128  ;;  %vm845_vm7 = vcmask 1048320  }
 0x478   :  { %v367_v58 = vshra.s32 %v365_v57, 16  ;;  %v366_v60 = vand.u32 65535, %v365_v57 }
 0x47a   :  { %v369_v59 = vcvt.s32.f32 %v367_v58  ;;  %v368_v62 = vcvt.s32.f32 %v366_v60 }
 0x47c   :  { %370 = vmin.xlane.f32.xlu0 %v369_v59 }
 0x509   :  { %v371_v61 = vpop.xlane.xlu0 %370 }
 0x50a   :  { %vm372_vm8 = vcmp.eq.f32.partialorder %v369_v59, %v371_v61  ;;  %v377_v0 = vcvt.f32.s32 %v371_v61 }
 0x50b   :  { %v373_v63 = vsel %vm372_vm8, %v368_v62, inf }
 0x50c   :  { %374 = vmin.xlane.f32.xlu0 %v373_v63  ;;  %v378_v5 = vshll.u32 %v377_v0, 16 }
 0x522   :  { %480 = vrot.lane.b32.xlu0 %v1844_v27, %s1688_s23 }
 0x599   :  { %v375_v1 = vpop.xlane.xlu0 %374 }
 0x59a   :  { %v376_v6 = vcvt.f32.s32 %v375_v1 }
 0x59c   :  { %v379_v9 = vadd.s32 %v378_v5, %v376_v6 }
 0x59d   :  { %v1985_v10 = vpop.permute.xlu0 %480 }
 0x59e   :  { %vm380_vm9 = vcmp.eq.s32.totalorder %v1867_v29, %v379_v9 }
 0x59f   :  { %1252 = vmatmul.mubr.msk.f32.vlgmr.msra.gmra.mrb[2].mxu0 %vm380_vm9, %v1687_v48 }
 0x5a0   :  { %1509 = vmatpush3.bf16.xpose.msk.msra.mxu0 %vm1728_vm1, %v1724_v3  ;;  %1286 = vmatprep.mubr.msk.f32.mxu0 %vm1684_vm2, %v1685_v7 }
 0x5a1   :  { %1510 = vmatprep.subr.bf16.mxu0 %v1683_v2 }
 0x5a8   :  { %1513 = vmatpush3.bf16.xpose.msk.msra.mxu0 %vm1728_vm1, %v1749_v8 }
 0x5a9   :  { %1514 = vmatprep.subr.bf16.mxu0 %v1683_v2 }
 0x5b0   :  { %1517 = vmatpush3.bf16.xpose.msk.msra.mxu0 %vm1728_vm1, %v1759_v11 }
 0x5b1   :  { %1518 = vmatprep.subr.bf16.mxu0 %v1683_v2 }
 0x5b8   :  { %1521 = vmatpush3.bf16.xpose.msk.msra.mxu0 %vm1728_vm1, %v1773_v14 }
 0x5b9   :  { %1522 = vmatprep.subr.bf16.mxu0 %v1683_v2 }
 0x5c0   :  { %1525 = vmatpush3.bf16.xpose.msk.msra.mxu0 %vm1728_vm1, %v1783_v17 }
 0x5c1   :  { %1526 = vmatprep.subr.bf16.mxu0 %v1683_v2 }
 0x5c8   :  { %1529 = vmatpush3.bf16.xpose.msk.msra.mxu0 %vm1728_vm1, %v1797_v20 }
 0x5c9   :  { %1530 = vmatprep.subr.bf16.mxu0 %v1683_v2 }
 0x5d0   :  { %1533 = vmatpush3.bf16.xpose.msk.msra.mxu0 %vm1728_vm1, %v1807_v23 }
 0x5d1   :  { %1534 = vmatprep.subr.bf16.mxu0 %v1683_v2 }
 0x5d8   :  { %1537 = vmatpush3.bf16.xpose.msk.msra.mxu0 %vm1728_vm1, %v1821_v26 }
 0x5d9   :  { %1594 = vmatprep.subr.bf16.mxu0 %v1683_v2 }
 0x5df   :  { %1287 = vmatmul.mubr.msk.f32.vlgmr.msra.gmra.mrb[4].mxu0 %vm44_vm0, %v1985_v10 }
 0x5e0   :  { %1596 = vmatpush3.bf16.msra.mxu0 %v1724_v3  ;;  %1391 = vmatprep.mubr.msk.f32.mxu0 %vm1684_vm2, %v1685_v7 }
 0x5e1   :  { %1597 = vmatprep.subr.bf16.mxu0 %v1683_v2 }
 0x5e4   :  { %1599 = vmatpush3.bf16.msra.mxu0 %v1749_v8 }
 0x5e5   :  { %1600 = vmatprep.subr.bf16.mxu0 %v1683_v2 }
 0x5e8   :  { %1602 = vmatpush3.bf16.msra.mxu0 %v1759_v11 }
 0x5e9   :  { %1603 = vmatprep.subr.bf16.mxu0 %v1683_v2 }
 0x5ec   :  { %1605 = vmatpush3.bf16.msra.mxu0 %v1773_v14 }
 0x5ed   :  { %1606 = vmatprep.subr.bf16.mxu0 %v1683_v2 }
 0x5f0   :  { %1608 = vmatpush3.bf16.msra.mxu0 %v1783_v17 }
 0x5f1   :  { %1609 = vmatprep.subr.bf16.mxu0 %v1683_v2 }
 0x5f4   :  { %1611 = vmatpush3.bf16.msra.mxu0 %v1797_v20 }
 0x5f5   :  { %1612 = vmatprep.subr.bf16.mxu0 %v1683_v2 }
 0x5f8   :  { %1614 = vmatpush3.bf16.msra.mxu0 %v1807_v23 }
 0x5f9   :  { %1615 = vmatprep.subr.bf16.mxu0 %v1683_v2 }
 0x5fc   :  { %1617 = vmatpush3.bf16.msra.mxu0 %v1821_v26 }
 0x672   :  { %v2006_v12 = vpop.f32.mrb[2].mxu0 }
 0x673   :  { %v1253_v13 = vpop.f32.mrb[3].mxu0  ;;  %v460_v43 = vsub.f32 %v2006_v12, %v1917_v49 }
 0x6b2   :  { %v550_v15 = vpop.f32.mrb[4].mxu0 }
 0x6b3   :  { %v554_v16 = vmul.f32 %v1872_v30, %v550_v15  ;;  %v1288_v18 = vpop.f32.mrb[5].mxu0 }
 0x6b5   :  { %v555_v19 = vsel %vm173_vm3, %v554_v16, -inf }
 0x6b6   :  { %556 = vmax.xlane.f32.xlu1 %v555_v19 }
 0x743   :  { %v557_v21 = vpop.xlane.xlu1 %556 }
 0x744   :  { %vm558_vm10 = vcmp.eq.f32.partialorder %v555_v19, %v557_v21 }
 0x745   :  { %v559_v22 = vsel %vm558_vm10, %v1867_v29, 128 }
 0x746   :  { %v561_v24 = vshra.s32 %v559_v22, 16  ;;  %v560_v31 = vand.u32 65535, %v559_v22 }
 0x748   :  { %v563_v25 = vcvt.s32.f32 %v561_v24  ;;  %v562_v33 = vcvt.s32.f32 %v560_v31 }
 0x74a   :  { %564 = vmin.xlane.f32.xlu0 %v563_v25 }
 0x7d7   :  { %v565_v32 = vpop.xlane.xlu0 %564 }
 0x7d8   :  { %vm566_vm11 = vcmp.eq.f32.partialorder %v563_v25, %v565_v32  ;;  %v571_v35 = vcvt.f32.s32 %v565_v32 }
 0x7d9   :  { %v567_v34 = vsel %vm566_vm11, %v562_v33, inf }
 0x7da   :  { %568 = vmin.xlane.f32.xlu1 %v567_v34  ;;  %v572_v37 = vshll.u32 %v571_v35, 16 }
 0x7eb   :  { %674 = vrot.lane.b32.xlu1 %v1844_v27, %s1689_s24 }
 0x867   :  { %v569_v36 = vpop.xlane.xlu1 %568 }
 0x868   :  { %v570_v38 = vcvt.f32.s32 %v569_v36 }
 0x86a   :  { %v573_v39 = vadd.s32 %v572_v37, %v570_v38 }
 0x86c   :  { %vm574_vm12 = vcmp.eq.s32.totalorder %v1867_v29, %v573_v39 }
 0x86d   :  { %1322 = vmatmul.mubr.msk.f32.vlgmr.msra.gmra.mrb[4].mxu1 %vm574_vm12, %v1687_v48 }
 0x86e   :  { %1565 = vmatpush3.bf16.xpose.msk.msra.mxu1 %vm1728_vm1, %v1724_v3  ;;  %1356 = vmatprep.mubr.msk.f32.mxu1 %vm1684_vm2, %v1685_v7  ;;  %v2049_v3 = vpop.permute.xlu1 %674 }
 0x86f   :  { %1566 = vmatprep.subr.bf16.mxu1 %v1683_v2 }
 0x876   :  { %1569 = vmatpush3.bf16.xpose.msk.msra.mxu1 %vm1728_vm1, %v1749_v8 }
 0x877   :  { %1570 = vmatprep.subr.bf16.mxu1 %v1683_v2 }
 0x87e   :  { %1573 = vmatpush3.bf16.xpose.msk.msra.mxu1 %vm1728_vm1, %v1759_v11 }
 0x87f   :  { %1574 = vmatprep.subr.bf16.mxu1 %v1683_v2 }
 0x886   :  { %1577 = vmatpush3.bf16.xpose.msk.msra.mxu1 %vm1728_vm1, %v1773_v14 }
 0x887   :  { %1578 = vmatprep.subr.bf16.mxu1 %v1683_v2 }
 0x88e   :  { %1581 = vmatpush3.bf16.xpose.msk.msra.mxu1 %vm1728_vm1, %v1783_v17 }
 0x88f   :  { %1582 = vmatprep.subr.bf16.mxu1 %v1683_v2 }
 0x896   :  { %1585 = vmatpush3.bf16.xpose.msk.msra.mxu1 %vm1728_vm1, %v1797_v20 }
 0x897   :  { %1586 = vmatprep.subr.bf16.mxu1 %v1683_v2 }
 0x89e   :  { %1589 = vmatpush3.bf16.xpose.msk.msra.mxu1 %vm1728_vm1, %v1807_v23 }
 0x89f   :  { %1590 = vmatprep.subr.bf16.mxu1 %v1683_v2  ;;  %v38_v2 = vshrl.u32 %v35_v28, 7 }
 0x8a1   :  { %v2059_v4 = vmul.u32 4, %v38_v2 }
 0x8a3   :  { %vm268_vm13 = vcmp.lt.s32.totalorder %v2059_v4, 16 }
 0x8a4   :  { %v917_v41 = vsel %vm268_vm13, 1.0, %v1685_v7 }
 0x8a5   :  { %v271_v44 = vmul.f32 %v917_v41, %v267_v40 }
 0x8a6   :  { %1593 = vmatpush3.bf16.xpose.msk.msra.mxu1 %vm1728_vm1, %v1821_v26  ;;  %v461_v26 = vadd.s32 1, %v2059_v4 }
 0x8a7   :  { %v272_v50 = vmul.f32 %v271_v44, %v271_v44 }
 0x8a8   :  { %vm462_vm14 = vcmp.lt.s32.totalorder %v461_v26, 16 }
 0x8a9   :  { %v937_v46 = vsel %vm462_vm14, 1.0, %v1685_v7  ;;  %v273_v53 = vsel %vm44_vm0, %v272_v50, 0.0 }
 0x8aa   :  { %v465_v51 = vmul.f32 %v937_v46, %v460_v43 }
 0x8ac   :  { %v466_v54 = vmul.f32 %v465_v51, %v465_v51 }
 0x8ad   :  { %1357 = vmatmul.mubr.msk.f32.vlgmr.msra.gmra.mrb[6].mxu1 %vm44_vm0, %v2049_v3 }
 0x8ae   :  { %v467_v55 = vsel %vm44_vm0, %v466_v54, 0.0 }
 0x940   :  { %v2053_v8 = vpop.f32.mrb[4].mxu1 }
 0x941   :  { %v1323_v11 = vpop.f32.mrb[5].mxu1  ;;  %v654_v27 = vsub.f32 %v2053_v8, %v1985_v10 }
 0x942   :  { %v849_v11 = vadd.s32 3, %v2059_v4 }
 0x944   :  { %vm850_vm4 = vcmp.lt.s32.totalorder %v849_v11, 16 }
 0x980   :  { %v744_v14 = vpop.f32.mrb[6].mxu1 }
 0x981   :  { %v748_v17 = vmul.f32 %v1872_v30, %v744_v14  ;;  %v1358_v20 = vpop.f32.mrb[7].mxu1  ;;  %v655_v30 = vadd.s32 2, %v2059_v4 }
 0x983   :  { %v749_v23 = vsel %vm173_vm3, %v748_v17, -inf  ;;  %vm656_vm1 = vcmp.lt.s32.totalorder %v655_v30, 16  ;;  %v977_v17 = vsel %vm850_vm4, 1.0, %v1685_v7 }
 0x984   :  { %750 = vmax.xlane.f32.xlu0 %v749_v23  ;;  %v957_v52 = vsel %vm656_vm1, 1.0, %v1685_v7 }
 0x985   :  { %v659_v49 = vmul.f32 %v957_v52, %v654_v27 }
 0x987   :  { %v660_v56 = vmul.f32 %v659_v49, %v659_v49 }
 0x989   :  { %v661_v57 = vsel %vm44_vm0, %v660_v56, 0.0 }
 0xa11   :  { %v751_v42 = vpop.xlane.xlu0 %750 }
 0xa12   :  { %vm752_vm15 = vcmp.eq.f32.partialorder %v749_v23, %v751_v42 }
 0xa13   :  { %v753_v28 = vsel %vm752_vm15, %v1867_v29, 128 }
 0xa14   :  { %v755_v45 = vshra.s32 %v753_v28, 16  ;;  %v754_v58 = vand.u32 65535, %v753_v28 }
 0xa16   :  { %v757_v47 = vcvt.s32.f32 %v755_v45  ;;  %v756_v60 = vcvt.s32.f32 %v754_v58 }
 0xa18   :  { %758 = vmin.xlane.f32.xlu0 %v757_v47 }
 0xa1c   :  { %274 = vadd.xlane.f32.xlu0 %v273_v53 }
 0xa20   :  { %468 = vadd.xlane.f32.xlu0 %v467_v55 }
 0xa24   :  { %662 = vadd.xlane.f32.xlu0 %v661_v57 }
 0xaa5   :  { %v759_v59 = vpop.xlane.xlu0 %758 }
 0xaa6   :  { %vm760_vm2 = vcmp.eq.f32.partialorder %v757_v47, %v759_v59  ;;  %v765_v35 = vcvt.f32.s32 %v759_v59 }
 0xaa7   :  { %v761_v61 = vsel %vm760_vm2, %v756_v60, inf }
 0xaa8   :  { %762 = vmin.xlane.f32.xlu1 %v761_v61  ;;  %v766_v37 = vshll.u32 %v765_v35, 16 }
 0xaa9   :  { %v275_v62 = vpop.xlane.xlu0 %274 }
 0xaaa   :  { %v276_v63 = vrot.slane %v275_v62, 4 }
 0xaac   :  { %v277_v0 = vadd.f32 %v276_v63, %v275_v62 }
 0xaad   :  { %v469_v1 = vpop.xlane.xlu0 %468 }
 0xaae   :  { %v278_v5 = vrot.slane %v277_v0, 2  ;;  %v470_v6 = vrot.slane %v469_v1, 4 }
 0xab0   :  { %v471_v9 = vadd.f32 %v470_v6, %v469_v1  ;;  %v279_v10 = vadd.f32 %v278_v5, %v277_v0 }
 0xab1   :  { %v663_v13 = vpop.xlane.xlu0 %662 }
 0xab2   :  { %v472_v15 = vrot.slane %v471_v9, 2  ;;  %v664_v16 = vrot.slane %v663_v13, 4  ;;  %v280_v18 = vrot.slane %v279_v10, 1 }
 0xab4   :  { %v665_v19 = vadd.f32 %v664_v16, %v663_v13  ;;  %v281_v21 = vadd.f32 %v280_v18, %v279_v10  ;;  %v473_v22 = vadd.f32 %v472_v15, %v471_v9 }
 0xab6   :  { %v666_v24 = vrot.slane %v665_v19, 2  ;;  %1618 = vpush %v281_v21  ;;  %v474_v25 = vrot.slane %v473_v22, 1 }
 0xab8   :  { %v475_v31 = vadd.f32 %v474_v25, %v473_v22  ;;  %v667_v32 = vadd.f32 %v666_v24, %v665_v19 }
 0xab9   :  { %648 = vrot.lane.b32.xlu1 %v2053_v8, %s1688_s23 }
 0xaba   :  { %1620 = vpush %v475_v31  ;;  %v668_v33 = vrot.slane %v667_v32, 1 }
 0xabc   :  { %v669_v34 = vadd.f32 %v668_v33, %v667_v32 }
 0xabe   :  { %1622 = vpush %v669_v34 }
 0xb35   :  { %v763_v36 = vpop.xlane.xlu1 %762 }
 0xb36   :  { %v764_v38 = vcvt.f32.s32 %v763_v36 }
 0xb38   :  { %v767_v39 = vadd.s32 %v766_v37, %v764_v38 }
 0xb39   :  { %v649_v7 = vpop.permute.xlu1 %648 }
 0xb3a   :  { %vm768_vm3 = vcmp.eq.s32.totalorder %v1867_v29, %v767_v39 }
 0xb3b   :  { %1392 = vmatmul.mubr.msk.f32.vlgmr.msra.gmra.mrb[6].mxu0 %vm768_vm3, %v1687_v48 }
 0xc0e   :  { %v837_v14 = vpop.f32.mrb[6].mxu0 }
 0xc0f   :  { %v848_v8 = vsub.f32 %v837_v14, %v2049_v3  ;;  %v1393_v20 = vpop.f32.mrb[7].mxu0 }
 0xc11   :  { %v853_v23 = vmul.f32 %v977_v17, %v848_v8 }
 0xc13   :  { %v854_v2 = vmul.f32 %v853_v23, %v853_v23 }
 0xc15   :  { %v855_v26 = vsel %vm44_vm0, %v854_v2, 0.0 }
 0xc16   :  { %856 = vadd.xlane.f32.xlu0 %v855_v26 }
 0xc2c   :  { %454 = vrot.lane.b32.xlu0 %v2006_v12, %s1689_s24 }
 0xc30   :  { %842 = vrot.lane.b32.xlu0 %v837_v14, %s1686_s2 }
 0xca3   :  { %v857_v29 = vpop.xlane.xlu0 %856 }
 0xca4   :  { %v858_v48 = vrot.slane %v857_v29, 4 }
 0xca6   :  { %v859_v4 = vadd.f32 %v858_v48, %v857_v29 }
 0xca7   :  { %v455_v40 = vpop.permute.xlu0 %454 }
 0xca8   :  { %v860_v3 = vrot.slane %v859_v4, 2  ;;  %458 = vst.msk [vmem:[#allocation2] sm:$0xff] %vm457_vm5, %v455_v40 }
 0xca9   :  { %652 = vst.msk [vmem:[#allocation2] sm:$0xff] %vm651_vm6, %v649_v7 }
 0xcaa   :  { %v861_v41 = vadd.f32 %v860_v3, %v859_v4 }
 0xcab   :  { %v843_v42 = vpop.permute.xlu0 %842 }
 0xcac   :  { %v862_v30 = vrot.slane %v861_v41, 1  ;;  %846 = vst.msk [vmem:[#allocation2] sm:$0xff] %vm845_vm7, %v843_v42 }
 0xcad   :  { %1646 = shalt.err (!%p1643_p4)
}
 0xcae   :  { %s1647_s30 = scalar_lea.hbm %s2115_s3, 128 }
 0xcaf   :  { %p1648_p5 = scmp.ne.s32.totalorder %s2115_s3, %s1647_s30  ;;  %p1651_p6 = scmp.lt.u32.totalorder %s1647_s30, %s2115_s3 }
 0xcb1   :  { %p1653_p7 = pnand %p1651_p6, %p1648_p5 }
 0xcb3   :  { %1656 = shalt.err (!%p1653_p7)
}
 0xcb4   :  { %878 = dma.vmem_to_hbm [thread:$0]  %s876_s26, 128, %s2115_s3, [#allocation3]   ;;  %v863_v12 = vadd.f32 %v862_v30, %v861_v41  ;;  %vm867_vm0 = vcmask 0  }
 0xcb5   :  { %s1619_s11 = spop %1618  ;;  %s1691_s16 = smov [#allocation4]  }
 0xcb6   :  { %1624 = vpush %v863_v12  ;;  %s1621_s12 = spop %1620  ;;  %s885_s17 = sshll.u32 %s1691_s16, 4  ;;  %s886_s17 = int_to_ptr.vmem [resolvable:$true] %s885_s17 }
 0xcb7   :  { %s1623_s13 = spop %1622  ;;  %s477_s14 = sadd.f32 %s1621_s12, %s1619_s11 }
 0xcb8   :  { %s1657_s20 = scalar_lea.vmem %s886_s17, 16  ;;  %s1661_s1 = scalar_lea.vmem %s886_s17, 32 }
 0xcb9   :  { %s671_s15 = sadd.f32 %s1623_s13, %s477_s14  ;;  %p1658_p8 = scmp.ne.s32.totalorder %s886_s17, %s1657_s20 }
 0xcba   :  { %p1662_p9 = scmp.lt.s32.totalorder %s886_s17, %s886_s17  ;;  %p1663_p10 = scmp.lt.s32.totalorder %s1661_s1, %s1657_s20 }
 0xcbc   :  { %p1664_p11 = por %p1663_p10, %p1662_p9 }
 0xcbe   :  { %p1665_p12 = pnand %p1664_p11, %p1658_p8 }
 0xce7   :  { %s1625_s18 = spop %1624 }
 0xce8   :  { %s865_s19 = sadd.f32 %s1625_s18, %s671_s15 }
 0xcea   :  { %v866_v43 = vstv %s865_s19 }
 0xceb   :  { %868 = vst.msk [vmem:[#allocation4] sm:$0x1] %vm867_vm0, %v866_v43 }
 0xcec   :  { %1668 = shalt.err (!%p1665_p12)
}
 0xced   :  { %s1669_s0 = scalar_lea.hbm %s2116_s4, 16 }
 0xcee   :  { %p1670_p13 = scmp.ne.s32.totalorder %s2116_s4, %s1669_s0  ;;  %p1673_p0 = scmp.lt.u32.totalorder %s1669_s0, %s2116_s4 }
 0xcf0   :  { %p1675_p1 = pnand %p1673_p0, %p1670_p13 }
 0xcf2   :  { %1678 = shalt.err (!%p1675_p1)
}
 0xcf3   :  { %888 = dma.vmem_to_hbm [thread:$0]  %s886_s17, 16, %s2116_s4, [#allocation5]  }
 0xcf4   :  { %1679 = dma.done.wait [#allocation3], 128  }
 0xcf5   :  { %1680 = vsyncadd [#allocation3], 4294967168 }
 0xcf6   :  { %1681 = dma.done.wait [#allocation5], 16  }
 0xcf7   :  { %1682 = vsyncadd [#allocation5], 4294967280 }
 0xcf8   :  { %895 = vsyncpa [#allocation3], 1 }
 0xcf9   :  { %896 = vsyncpa [#allocation5], 1 }

</bundles_post_ra>
